<compile_context>
chip_gen: v7x
topology: tpu7x:2x2x1
jax: 0.10.0
libtpu: 0.0.40
codegen_flags: <defaults>
</compile_context>

<pallas_src>
import jax
import jax.numpy as jnp
from jax import lax
from jax.experimental import pallas as pl
from jax.experimental.pallas import tpu as pltpu

# ----------------------------- model constants ------------------------------
HIDDEN = 1024            # BERT-large hidden size (fc = Linear(1024, num_classes))
NUM_CLASSES = 2
DROPOUT_P = 0.3
BATCH = 2
SEQ = 8
VOCAB = 30
VOCAB_PAD = 32           # embedding rows padded to a multiple of 8 (zero rows)
C_PAD = 128              # output columns padded to one full lane group


# ------------------------------ Pallas kernel -------------------------------
def _emotion_head_kernel(ids_ref, scale_ref, emb_ref, w_ref, b_ref, out_ref):
    """Fused CLS-embedding gather + (dropout * mask) + fc matmul + bias.

    ids_ref   : (B_pad, 1)        int32    -- CLS token ids
    scale_ref : (B_pad, HIDDEN)   float32  -- dropout-keep/(1-p) * attention-mask(CLS)
    emb_ref   : (VOCAB_PAD, H)    bfloat16 -- embedding table (stub encoder), zero-padded rows
    w_ref     : (H, C_PAD)        bfloat16 -- fc weight (torch (C,H) pre-transposed, zero-padded cols)
    b_ref     : (1, C_PAD)        float32  -- fc bias (zero-padded cols)
    out_ref   : (B_pad, C_PAD)    float32  -- logits (lane-dense, unmasked stores)
    """
    b_pad = ids_ref.shape[0]

    # --- Embedding gather as a one-hot MXU matmul (no scalar loops, no HBM round trip).
    ids = ids_ref[...]                                                  # (B_pad, 1) int32
    vocab_iota = lax.broadcasted_iota(jnp.int32, (b_pad, VOCAB_PAD), 1)  # (B_pad, V_pad)
    one_hot = (vocab_iota == ids).astype(emb_ref.dtype)                 # bf16 exact 0/1
    x = jnp.dot(one_hot, emb_ref[...], preferred_element_type=jnp.float32)  # (B_pad, H) f32

    # --- Dropout (inverted scaling) + CLS attention-mask, pre-combined into one multiplier.
    x = x * scale_ref[...]                                              # f32 VPU multiply

    # --- fc: (B_pad, H) @ (H, C_PAD) + (1, C_PAD); bf16 MXU operands, f32 accumulation.
    logits = jnp.dot(x.astype(jnp.bfloat16), w_ref[...],
                     preferred_element_type=jnp.float32) + b_ref[...]
    out_ref[...] = logits.astype(out_ref.dtype)


def emotion_head(cls_ids, scale, emb, w, b):
    """cls_ids: (B_pad, 1) i32; scale: (B_pad, H) f32; emb: (V_pad, H) bf16;
    w: (H, C_PAD) bf16; b: (1, C_PAD) f32  ->  logits (B_pad, C_PAD) f32."""
    b_pad = cls_ids.shape[0]
    vmem = pl.BlockSpec(memory_space=pltpu.MemorySpace.VMEM)
    return pl.pallas_call(
        _emotion_head_kernel,
        out_shape=jax.ShapeDtypeStruct((b_pad, C_PAD), jnp.float32),
        in_specs=[vmem, vmem, vmem, vmem, vmem],
        out_specs=vmem,
    )(cls_ids, scale, emb, w, b)


# ------------------------------ full forward --------------------------------
def emotion_model_forward(input_ids, attention_mask, params, dropout_key, train=True):
    """Mirrors EmotionModel.forward for x = {'input_ids', 'attention_mask'}."""
    # TODO(synk): the pretrained BERT encoder (AutoModel.from_pretrained) has no
    # reproducible in-script definition; a deterministic embedding lookup of the CLS
    # token stands in for bert_model(...).last_hidden_state[:, 0, :].
    B, _ = input_ids.shape
    b_pad = max(8, -(-B // 8) * 8)                     # sublane-dense batch (multiple of 8)

    cls_ids = input_ids[:, 0].astype(jnp.int32)        # last_hidden_state[:, 0, :] selector
    cls_mask = attention_mask[:, 0].astype(jnp.float32)

    ids_p = jnp.zeros((b_pad, 1), jnp.int32).at[:B, 0].set(cls_ids)
    mask_p = jnp.zeros((b_pad,), jnp.float32).at[:B].set(cls_mask)

    # Dropout(p=0.3): inverted scaling in train mode, identity in eval mode.
    # (Keep-mask is generated host-side; it will not bit-match torch's RNG stream.)
    if train:
        keep = jax.random.bernoulli(dropout_key, 1.0 - DROPOUT_P, (b_pad, HIDDEN))
        drop_scale = keep.astype(jnp.float32) * (1.0 / (1.0 - DROPOUT_P))
    else:
        drop_scale = jnp.ones((b_pad, HIDDEN), jnp.float32)
    scale = drop_scale * mask_p[:, None]               # fold CLS mask into the same multiplier

    out = emotion_head(ids_p, scale, params["embedding"], params["fc_w"], params["fc_b"])
    logits = out[:B, :NUM_CLASSES]
    # torch.squeeze(out): no-op for B > 1 and C > 1; mirrors the reference module.
    return jnp.squeeze(logits)


def init_params(key):
    k_emb, k_w, k_b = jax.random.split(key, 3)
    emb = jax.random.normal(k_emb, (VOCAB, HIDDEN), jnp.float32) * 0.02
    emb = jnp.zeros((VOCAB_PAD, HIDDEN), jnp.float32).at[:VOCAB].set(emb)
    # torch Linear(1024, C) stores weight as (C, 1024); keep it pre-transposed and
    # zero-padded to a lane-dense 128-wide output slab.
    w = jax.random.normal(k_w, (HIDDEN, NUM_CLASSES), jnp.float32) * 0.02
    w = jnp.zeros((HIDDEN, C_PAD), jnp.float32).at[:, :NUM_CLASSES].set(w)
    b = jax.random.normal(k_b, (NUM_CLASSES,), jnp.float32) * 0.02
    b = jnp.zeros((1, C_PAD), jnp.float32).at[0, :NUM_CLASSES].set(b)
    return {
        "embedding": emb.astype(jnp.bfloat16),   # bf16 at rest: halves DMA bytes, MXU-native
        "fc_w": w.astype(jnp.bfloat16),
        "fc_b": b,                                # bias added post-accumulation in f32
    }


if __name__ == "__main__":
    key = jax.random.PRNGKey(0)
    params = init_params(key)

    k_ids = jax.random.fold_in(key, 1)
    k_drop = jax.random.fold_in(key, 2)
    input_ids = jax.random.randint(k_ids, (BATCH, SEQ), 0, VOCAB, dtype=jnp.int32)
    attention_mask = jnp.ones((BATCH, SEQ), dtype=jnp.int32)

    logits = emotion_model_forward(input_ids, attention_mask, params, k_drop, train=True)
    logits = jax.block_until_ready(logits)
    assert logits.shape == (BATCH, NUM_CLASSES), logits.shape
    print("KERNEL_OK")
</pallas_src>

<mosaic_0001>
module attributes {stable_mosaic.version = 11 : i64} {
  func.func @_emotion_head_kernel(%arg0: memref<8x1xi32, #tpu.memory_space<vmem>>, %arg1: memref<8x1024xf32, #tpu.memory_space<vmem>>, %arg2: memref<32x1024xbf16, #tpu.memory_space<vmem>>, %arg3: memref<1024x128xbf16, #tpu.memory_space<vmem>>, %arg4: memref<1x128xf32, #tpu.memory_space<vmem>>, %arg5: memref<8x128xf32, #tpu.memory_space<vmem>>) attributes {dimension_semantics = [], scalar_prefetch = 0 : i64, scratch_operands = 0 : i64, tpu.core_type = #tpu.core_type<tc>} {
    %c0 = arith.constant 0 : index
    %c0_0 = arith.constant 0 : index
    %0 = vector.load %arg0[%c0, %c0_0] : memref<8x1xi32, #tpu.memory_space<vmem>>, vector<8x1xi32>
    %1 = tpu.iota {dimensions = array<i32: 1>} : vector<8x32xi32>
    %2 = vector.broadcast %0 : vector<8x1xi32> to vector<8x32xi32>
    %3 = arith.cmpi eq, %1, %2 : vector<8x32xi32>
    %4 = arith.extui %3 : vector<8x32xi1> to vector<8x32xi32>
    %5 = arith.sitofp %4 : vector<8x32xi32> to vector<8x32xf32>
    %6 = arith.truncf %5 : vector<8x32xf32> to vector<8x32xbf16>
    %c0_1 = arith.constant 0 : index
    %c0_2 = arith.constant 0 : index
    %7 = vector.load %arg2[%c0_1, %c0_2] : memref<32x1024xbf16, #tpu.memory_space<vmem>>, vector<32x1024xbf16>
    %cst = arith.constant dense<0.000000e+00> : vector<8x1024xf32>
    %8 = tpu.matmul %6, %7, %cst {dimension_numbers = #tpu.dot_dimension_numbers<[1], [0], [0], [1], [0, 0, 1, 1], [], []>} : vector<8x32xbf16>, vector<32x1024xbf16>, vector<8x1024xf32> -> vector<8x1024xf32>
    %c0_3 = arith.constant 0 : index
    %c0_4 = arith.constant 0 : index
    %9 = vector.load %arg1[%c0_3, %c0_4] : memref<8x1024xf32, #tpu.memory_space<vmem>>, vector<8x1024xf32>
    %10 = arith.mulf %8, %9 : vector<8x1024xf32>
    %11 = arith.truncf %10 : vector<8x1024xf32> to vector<8x1024xbf16>
    %c0_5 = arith.constant 0 : index
    %c0_6 = arith.constant 0 : index
    %12 = vector.load %arg3[%c0_5, %c0_6] : memref<1024x128xbf16, #tpu.memory_space<vmem>>, vector<1024x128xbf16>
    %cst_7 = arith.constant dense<0.000000e+00> : vector<8x128xf32>
    %13 = tpu.matmul %11, %12, %cst_7 {dimension_numbers = #tpu.dot_dimension_numbers<[1], [0], [0], [1], [0, 0, 1, 1], [], []>} : vector<8x1024xbf16>, vector<1024x128xbf16>, vector<8x128xf32> -> vector<8x128xf32>
    %c0_8 = arith.constant 0 : index
    %c0_9 = arith.constant 0 : index
    %14 = vector.load %arg4[%c0_8, %c0_9] : memref<1x128xf32, #tpu.memory_space<vmem>>, vector<1x128xf32>
    %15 = vector.broadcast %14 : vector<1x128xf32> to vector<8x128xf32>
    %16 = arith.addf %13, %15 : vector<8x128xf32>
    %c0_10 = arith.constant 0 : index
    %c0_11 = arith.constant 0 : index
    %17 = vector.load %arg5[%c0_10, %c0_11] : memref<8x128xf32, #tpu.memory_space<vmem>>, vector<8x128xf32>
    tpu.vector_store %arg5[%c0_10, %c0_11], %16 {strides = array<i32>} : memref<8x128xf32, #tpu.memory_space<vmem>>, vector<8x128xf32>,
    return
  }
}

</mosaic_0001>

<bundles_post_ra>
// kernel: tpu_custom_call.1
= control target key start
LH: loop header
LB: loop body
LE: loop exit
PB: predicated region body
PF: predicated region fallthrough
CT: control target
= control target key end

     0   :  { %10 = vsyncpa [#allocation3], 0  ;;  %s1507_s0 = inlined_call_operand.vmem [shape: s32[8,1], index: 0, kind: input, shape index: {}]   ;;  %s1508_s1 = inlined_call_operand.hbm [shape: f32[8,1024], index: 1, kind: input, shape index: {}]   ;;  %s1509_s2 = inlined_call_operand.hbm [shape: bf16[32,1024], index: 2, kind: input, shape index: {}]   ;;  %s1510_s3 = inlined_call_operand.hbm [shape: bf16[1024,128], index: 3, kind: input, shape index: {}]   ;;  %s1511_s4 = inlined_call_operand.vmem [shape: f32[1,128], index: 4, kind: input, shape index: {}]   ;;  %s1512_s5 = inlined_call_operand.hbm [shape: f32[8,128], index: 5, kind: output, shape index: {}]  }
   0x1   :  { %11 = vsyncpa [#allocation6], 0 }
   0x2   :  { %12 = vsyncpa [#allocation4], 0  ;;  %s1398_s18 = smov [#allocation5]   ;;  %s1304_s22 = scalar_lea.hbm %s1509_s2, 2048 }
   0x3   :  { %s30_s19 = sshll.u32 %s1398_s18, 4  ;;  %p1305_p0 = scmp.ne.s32.totalorder %s1509_s2, %s1304_s22  ;;  %s31_s19 = int_to_ptr.vmem [resolvable:$true] %s30_s19 }
   0x4   :  { %p1308_p1 = scmp.lt.u32.totalorder %s1304_s22, %s1509_s2 }
   0x6   :  { %p1310_p2 = pnand %p1308_p1, %p1305_p0 }
   0x8   :  { %1313 = shalt.err (!%p1310_p2)
}
   0x9   :  { %s1314_s27 = scalar_lea.vmem %s31_s19, 2048  ;;  %p1319_p4 = scmp.lt.s32.totalorder %s31_s19, %s31_s19 }
   0xa   :  { %p1315_p3 = scmp.ne.s32.totalorder %s31_s19, %s1314_s27  ;;  %p1320_p5 = scmp.lt.s32.totalorder %s1314_s27, %s1314_s27 }
   0xc   :  { %p1321_p6 = por %p1320_p5, %p1319_p4 }
   0xe   :  { %p1322_p7 = pnand %p1321_p6, %p1315_p3 }
  0x10   :  { %1325 = shalt.err (!%p1322_p7)
}
  0x11   :  { %s1399_s28 = smov 512   ;;  %s1400_s29 = smov 32  }
  0x12   :  { %36 = dma.hbm_to_vmem [thread:$0]  %s1509_s2, 2048, %s31_s19, [#allocation6], %s1399_s28, %s1399_s28, %s1400_s29  }
  0x13   :  { %s1401_s7 = smov [#allocation2]   ;;  %s1402_s9 = smov [#allocation7]  }
  0x14   :  { %s21_s8 = sshll.u32 %s1401_s7, 4  ;;  %s42_s10 = sshll.u32 %s1402_s9, 4  ;;  %s22_s8 = int_to_ptr.vmem [resolvable:$true] %s21_s8  ;;  %s43_s10 = int_to_ptr.vmem [resolvable:$true] %s42_s10 }
  0x15   :  { %s1326_s13 = scalar_lea.hbm %s1508_s1, 1024 }
  0x16   :  { %p1327_p8 = scmp.ne.s32.totalorder %s1508_s1, %s1326_s13  ;;  %p1330_p9 = scmp.lt.u32.totalorder %s1326_s13, %s1508_s1 }
  0x18   :  { %p1332_p10 = pnand %p1330_p9, %p1327_p8 }
  0x1a   :  { %1335 = shalt.err (!%p1332_p10)
}
  0x1b   :  { %s1336_s2 = scalar_lea.vmem %s22_s8, 1024  ;;  %p1341_p12 = scmp.lt.s32.totalorder %s22_s8, %s22_s8 }
  0x1c   :  { %p1337_p11 = scmp.ne.s32.totalorder %s22_s8, %s1336_s2  ;;  %p1342_p13 = scmp.lt.s32.totalorder %s1336_s2, %s1336_s2 }
  0x1e   :  { %p1343_p0 = por %p1342_p13, %p1341_p12 }
  0x20   :  { %p1344_p1 = pnand %p1343_p0, %p1337_p11 }
  0x22   :  { %1347 = shalt.err (!%p1344_p1)
}
  0x23   :  { %24 = dma.hbm_to_vmem [thread:$0]  %s1508_s1, 1024, %s22_s8, [#allocation3]  }
  0x24   :  { %s1348_s22 = scalar_lea.hbm %s1510_s3, 8192 }
  0x25   :  { %p1349_p2 = scmp.ne.s32.totalorder %s1510_s3, %s1348_s22  ;;  %p1352_p3 = scmp.lt.u32.totalorder %s1348_s22, %s1510_s3 }
  0x27   :  { %p1354_p4 = pnand %p1352_p3, %p1349_p2 }
  0x29   :  { %1357 = shalt.err (!%p1354_p4)
}
  0x2a   :  { %s1358_s27 = scalar_lea.vmem %s43_s10, 8192  ;;  %p1363_p6 = scmp.lt.s32.totalorder %s43_s10, %s43_s10 }
  0x2b   :  { %p1359_p5 = scmp.ne.s32.totalorder %s43_s10, %s1358_s27  ;;  %p1364_p7 = scmp.lt.s32.totalorder %s1358_s27, %s1358_s27 }
  0x2d   :  { %p1365_p8 = por %p1364_p7, %p1363_p6 }
  0x2f   :  { %p1366_p9 = pnand %p1365_p8, %p1359_p5 }
  0x31   :  { %1369 = shalt.err (!%p1366_p9)
}
  0x32   :  { %s1403_s1 = smov 64   ;;  %s1404_s28 = smov 4  }
  0x33   :  { %48 = dma.hbm_to_vmem [thread:$0]  %s1510_s3, 8192, %s43_s10, [#allocation6], %s1403_s1, %s1403_s1, %s1404_s28  }
  0x34   :  { %1392 = dma.done.wait [#allocation3], 1024  }
  0x35   :  { %1393 = vsyncadd [#allocation3], 4294966272 }
  0x36   :  { %1394 = dma.done.wait [#allocation6], 10240  }
  0x37   :  { %1395 = vsyncadd [#allocation6], 4294957056  ;;  %v1405_v0 = vmov 0   ;;  %v61_v1 = vld [vmem:[%s1507_s0] sm:$0xff]  ;;  %v72_v5 = vld [vmem:[#allocation5 + $0x8] sm:$0xff]  ;;  %v62_v26 = vlaneseq  ;;  %v1406_v33 = vmov 0.0  }
  0x38   :  { %1239 = vset.pattern.permute.xlu0 %v1405_v0  ;;  %203 = vmatprep.mubr.bf16.mxu0 %v1405_v0  ;;  %v71_v2 = vld [vmem:[#allocation5] sm:$0xff]  ;;  %v76_v6 = vld [vmem:[#allocation5 + $0x28] sm:$0xff]  ;;  %v73_v16 = vld [vmem:[#allocation5 + $0x10] sm:$0xff]  ;;  %vm167_vm1 = vcmask 261120  }
  0x39   :  { %244 = vmatprep.mubr.bf16.mxu1 %v1405_v0  ;;  %v75_v3 = vld [vmem:[#allocation5 + $0x20] sm:$0xff]  ;;  %65 = vperm.xlu0 %1239, %v61_v1   ;;  %v1059_v9 = vcombine.high %v72_v5, %v76_v6  ;;  %v1058_v10 = vcombine.low %v72_v5, %v76_v6  ;;  %v80_v12 = vld [vmem:[#allocation5 + $0x48] sm:$0xff]  ;;  %v77_v17 = vld [vmem:[#allocation5 + $0x30] sm:$0xff]  ;;  %v63_v27 = vand.u32 127, %v62_v26 }
  0x3a   :  { %v1057_v4 = vcombine.high %v71_v2, %v75_v3  ;;  %v1056_v7 = vcombine.low %v71_v2, %v75_v3  ;;  %v79_v8 = vld [vmem:[#allocation5 + $0x40] sm:$0xff]  ;;  %v84_v13 = vld [vmem:[#allocation5 + $0x68] sm:$0xff]  ;;  %v74_v18 = vld [vmem:[#allocation5 + $0x18] sm:$0xff]  ;;  %v1060_v20 = vcombine.low %v73_v16, %v77_v17  ;;  %v1061_v23 = vcombine.high %v73_v16, %v77_v17 }
  0x3b   :  { %v83_v11 = vld [vmem:[#allocation5 + $0x60] sm:$0xff]  ;;  %v1067_v15 = vcombine.high %v80_v12, %v84_v13  ;;  %212 = vmatprep.subr.bf16.mxu1 %v1059_v9  ;;  %v78_v21 = vld [vmem:[#allocation5 + $0x38] sm:$0xff]  ;;  %v1066_v22 = vcombine.low %v80_v12, %v84_v13  ;;  %v81_v28 = vld [vmem:[#allocation5 + $0x50] sm:$0xff] }
  0x3c   :  { %171 = vmatprep.subr.bf16.mxu0 %v1057_v4  ;;  %v1065_v14 = vcombine.high %v79_v8, %v83_v11  ;;  %v1064_v19 = vcombine.low %v79_v8, %v83_v11  ;;  %213 = vmatpush1.bf16.msra.mxu1 %v1058_v10  ;;  %v1062_v24 = vcombine.low %v74_v18, %v78_v21  ;;  %v85_v30 = vld [vmem:[#allocation5 + $0x70] sm:$0xff]  ;;  %v82_v31 = vld [vmem:[#allocation5 + $0x58] sm:$0xff]  ;;  %v1240_v40 = vld [vmem:[#allocation7 + $0x40] sm:$0xff]  }
  0x3d   :  { %172 = vmatpush1.bf16.msra.mxu0 %v1056_v7  ;;  %214 = vmatprep.subr.bf16.mxu1 %v1067_v15  ;;  %v1063_v25 = vcombine.high %v74_v18, %v78_v21  ;;  %v86_v32 = vld [vmem:[#allocation5 + $0x78] sm:$0xff]  ;;  %v1069_v36 = vcombine.high %v81_v28, %v85_v30  ;;  %v1068_v38 = vcombine.low %v81_v28, %v85_v30  ;;  %v1241_v41 = vld [vmem:[#allocation7 + $0xc0] sm:$0xff]   ;;  %v1244_v44 = vld [vmem:[#allocation7 + $0x48] sm:$0xff]  }
  0x3e   :  { %173 = vmatprep.subr.bf16.mxu0 %v1065_v14  ;;  %v1071_v37 = vcombine.high %v82_v31, %v86_v32  ;;  %v1070_v39 = vcombine.low %v82_v31, %v86_v32  ;;  %v1242_v42 = vld [vmem:[#allocation7] sm:$0xff]   ;;  %v1245_v45 = vld [vmem:[#allocation7 + $0xc8] sm:$0xff]   ;;  %v1248_v48 = vld [vmem:[#allocation7 + $0x50] sm:$0xff]  }
  0x3f   :  { %v1243_v43 = vld [vmem:[#allocation7 + $0x80] sm:$0xff]   ;;  %v1246_v46 = vld [vmem:[#allocation7 + $0x8] sm:$0xff]   ;;  %v1249_v49 = vld [vmem:[#allocation7 + $0xd0] sm:$0xff]  }
  0x40   :  { %215 = vmatpush1.bf16.msra.mxu1 %v1066_v22  ;;  %v1247_v47 = vld [vmem:[#allocation7 + $0x88] sm:$0xff]   ;;  %v1250_v50 = vld [vmem:[#allocation7 + $0x10] sm:$0xff]   ;;  %v1252_v52 = vld [vmem:[#allocation7 + $0x58] sm:$0xff]  }
  0x41   :  { %174 = vmatpush1.bf16.msra.mxu0 %v1064_v19  ;;  %294 = vmatprep.subr.bf16.mxu1 %v1063_v25  ;;  %v1251_v51 = vld [vmem:[#allocation7 + $0x90] sm:$0xff]   ;;  %v1253_v53 = vld [vmem:[#allocation7 + $0xd8] sm:$0xff]   ;;  %v1256_v56 = vld [vmem:[#allocation7 + $0x60] sm:$0xff]  }
  0x42   :  { %253 = vmatprep.subr.bf16.mxu0 %v1061_v23  ;;  %v1254_v54 = vld [vmem:[#allocation7 + $0x18] sm:$0xff]   ;;  %v1257_v57 = vld [vmem:[#allocation7 + $0xe0] sm:$0xff]   ;;  %v1260_v60 = vld [vmem:[#allocation7 + $0x68] sm:$0xff]  }
  0x43   :  { %v1255_v55 = vld [vmem:[#allocation7 + $0x98] sm:$0xff]   ;;  %v1258_v58 = vld [vmem:[#allocation7 + $0x20] sm:$0xff]   ;;  %v1261_v61 = vld [vmem:[#allocation7 + $0xe8] sm:$0xff]  }
  0x44   :  { %v1259_v59 = vld [vmem:[#allocation7 + $0xa0] sm:$0xff]   ;;  %v1262_v62 = vld [vmem:[#allocation7 + $0x28] sm:$0xff]   ;;  %v1265_v1 = vld [vmem:[#allocation7 + $0xf0] sm:$0xff]  }
  0x45   :  { %v1263_v63 = vld [vmem:[#allocation7 + $0xa8] sm:$0xff]   ;;  %v1266_v2 = vld [vmem:[#allocation7 + $0x30] sm:$0xff]   ;;  %v1268_v4 = vld [vmem:[#allocation7 + $0x78] sm:$0xff]  }
  0x46   :  { %v1267_v3 = vld [vmem:[#allocation7 + $0xb0] sm:$0xff]   ;;  %v1269_v5 = vld [vmem:[#allocation7 + $0xf8] sm:$0xff]   ;;  %v1272_v8 = vld [vmem:[#allocation7 + $0x140] sm:$0xff]  }
  0x47   :  { %v1270_v6 = vld [vmem:[#allocation7 + $0x38] sm:$0xff]   ;;  %v1273_v9 = vld [vmem:[#allocation7 + $0x1c0] sm:$0xff]   ;;  %v337_v11 = vld [vmem:[#allocation2 + $0x10] sm:$0xff] }
  0x48   :  { %v1271_v7 = vld [vmem:[#allocation7 + $0xb8] sm:$0xff]   ;;  %v335_v10 = vld [vmem:[#allocation2] sm:$0xff]  ;;  %v336_v12 = vld [vmem:[#allocation2 + $0x8] sm:$0xff] }
  0x49   :  { %v338_v13 = vld [vmem:[#allocation2 + $0x18] sm:$0xff]  ;;  %v1274_v28 = vld [vmem:[#allocation7 + $0x100] sm:$0xff]   ;;  %v1276_v32 = vld [vmem:[#allocation7 + $0x148] sm:$0xff]  }
  0xb8   :  { %v66_v29 = vpop.permute.xlu0 %65 }
  0xb9   :  { %vm67_vm0 = vcmp.eq.s32.totalorder %v63_v27, %v66_v29  ;;  %v1275_v29 = vld [vmem:[#allocation7 + $0x180] sm:$0xff]  }
  0xba   :  { %v1055_v34 = vsel %vm67_vm0, 1.0, %v1406_v33  ;;  %v1277_v33 = vld [vmem:[#allocation7 + $0x1c8] sm:$0xff]  }
  0xbb   :  { %v70_v35 = vpack.c.bf16 %v1055_v34, %v1055_v34  ;;  %v340_v34 = vld [vmem:[#allocation2 + $0x28] sm:$0xff] }
  0xbd   :  { %1072 = vmatmul.mubr.msk.bf16.vlgmr.msra.gmra.mrb[0].mxu0 %vm167_vm1, %v70_v35  ;;  %1073 = vmatmul.mubr.msk.bf16.vlgmr.msra.gmra.mrb[0].mxu1 %vm167_vm1, %v70_v35 }
  0xbe   :  { %254 = vmatpush1.bf16.msra.mxu0 %v1060_v20  ;;  %295 = vmatpush1.bf16.msra.mxu1 %v1062_v24 }
  0xbf   :  { %255 = vmatprep.subr.bf16.mxu0 %v1069_v36  ;;  %296 = vmatprep.subr.bf16.mxu1 %v1071_v37 }
  0xc0   :  { %285 = vmatprep.mubr.bf16.mxu0 %v1405_v0  ;;  %326 = vmatprep.mubr.bf16.mxu1 %v1405_v0  ;;  %v1264_v0 = vld [vmem:[#allocation7 + $0x70] sm:$0xff]  }
  0xc2   :  { %256 = vmatpush1.bf16.msra.mxu0 %v1068_v38  ;;  %297 = vmatpush1.bf16.msra.mxu1 %v1070_v39  ;;  %v1278_v38 = vld [vmem:[#allocation7 + $0x108] sm:$0xff]  }
  0xc3   :  { %1141 = vmatprep.subr.bf16.mxu0 %v1240_v40  ;;  %1163 = vmatprep.subr.bf16.mxu1 %v1241_v41  ;;  %v1279_v39 = vld [vmem:[#allocation7 + $0x188] sm:$0xff]  }
  0xc5   :  { %1074 = vmatmul.mubr.msk.bf16.vlgmr.msra.gmra.mrb[4].mxu0 %vm167_vm1, %v70_v35  ;;  %1075 = vmatmul.mubr.msk.bf16.vlgmr.msra.gmra.mrb[4].mxu1 %vm167_vm1, %v70_v35  ;;  %v342_v35 = vld [vmem:[#allocation2 + $0x38] sm:$0xff] }
  0xc6   :  { %1142 = vmatpush3.bf16.msra.mxu0 %v1242_v42  ;;  %1164 = vmatpush3.bf16.msra.mxu1 %v1243_v43  ;;  %v1280_v42 = vld [vmem:[#allocation7 + $0x150] sm:$0xff]  }
  0xc7   :  { %1143 = vmatprep.subr.bf16.mxu0 %v1244_v44  ;;  %1165 = vmatprep.subr.bf16.mxu1 %v1245_v45  ;;  %v1281_v43 = vld [vmem:[#allocation7 + $0x1d0] sm:$0xff]  }
  0xca   :  { %1144 = vmatpush3.bf16.msra.mxu0 %v1246_v46  ;;  %1166 = vmatpush3.bf16.msra.mxu1 %v1247_v47 }
  0xcb   :  { %1145 = vmatprep.subr.bf16.mxu0 %v1248_v48  ;;  %1167 = vmatprep.subr.bf16.mxu1 %v1249_v49 }
  0xce   :  { %1146 = vmatpush3.bf16.msra.mxu0 %v1250_v50  ;;  %1168 = vmatpush3.bf16.msra.mxu1 %v1251_v51 }
  0xcf   :  { %1147 = vmatprep.subr.bf16.mxu0 %v1252_v52  ;;  %1169 = vmatprep.subr.bf16.mxu1 %v1253_v53  ;;  %v1282_v52 = vld [vmem:[#allocation7 + $0x110] sm:$0xff]  }
  0xd0   :  { %v1283_v53 = vld [vmem:[#allocation7 + $0x190] sm:$0xff]  }
  0xd2   :  { %1148 = vmatpush3.bf16.msra.mxu0 %v1254_v54  ;;  %1170 = vmatpush3.bf16.msra.mxu1 %v1255_v55  ;;  %v1284_v54 = vld [vmem:[#allocation7 + $0x158] sm:$0xff]  }
  0xd3   :  { %1149 = vmatprep.subr.bf16.mxu0 %v1256_v56  ;;  %1171 = vmatprep.subr.bf16.mxu1 %v1257_v57  ;;  %v1285_v55 = vld [vmem:[#allocation7 + $0x1d8] sm:$0xff]  }
  0xd4   :  { %v1286_v56 = vld [vmem:[#allocation7 + $0x118] sm:$0xff]  }
  0xd5   :  { %v1287_v57 = vld [vmem:[#allocation7 + $0x198] sm:$0xff]  }
  0xd6   :  { %1150 = vmatpush3.bf16.msra.mxu0 %v1258_v58  ;;  %1172 = vmatpush3.bf16.msra.mxu1 %v1259_v59  ;;  %v1288_v58 = vld [vmem:[#allocation7 + $0x160] sm:$0xff]  }
  0xd7   :  { %1151 = vmatprep.subr.bf16.mxu0 %v1260_v60  ;;  %1173 = vmatprep.subr.bf16.mxu1 %v1261_v61  ;;  %v1289_v59 = vld [vmem:[#allocation7 + $0x1e0] sm:$0xff]  }
  0xd8   :  { %v1290_v60 = vld [vmem:[#allocation7 + $0x120] sm:$0xff]  }
  0xd9   :  { %v1291_v61 = vld [vmem:[#allocation7 + $0x1a0] sm:$0xff]  }
  0xda   :  { %1152 = vmatpush3.bf16.msra.mxu0 %v1262_v62  ;;  %1174 = vmatpush3.bf16.msra.mxu1 %v1263_v63  ;;  %v1292_v62 = vld [vmem:[#allocation7 + $0x168] sm:$0xff]  }
  0xdb   :  { %1153 = vmatprep.subr.bf16.mxu0 %v1264_v0  ;;  %1175 = vmatprep.subr.bf16.mxu1 %v1265_v1  ;;  %v1293_v63 = vld [vmem:[#allocation7 + $0x1e8] sm:$0xff]  }
  0xdc   :  { %v1294_v0 = vld [vmem:[#allocation7 + $0x128] sm:$0xff]  }
  0xdd   :  { %v1295_v1 = vld [vmem:[#allocation7 + $0x1a8] sm:$0xff]  }
  0xde   :  { %1154 = vmatpush3.bf16.msra.mxu0 %v1266_v2  ;;  %1176 = vmatpush3.bf16.msra.mxu1 %v1267_v3  ;;  %v1296_v2 = vld [vmem:[#allocation7 + $0x170] sm:$0xff]  }
  0xdf   :  { %1155 = vmatprep.subr.bf16.mxu0 %v1268_v4  ;;  %1177 = vmatprep.subr.bf16.mxu1 %v1269_v5  ;;  %v1297_v3 = vld [vmem:[#allocation7 + $0x1f0] sm:$0xff]  }
  0xe0   :  { %v1298_v4 = vld [vmem:[#allocation7 + $0x130] sm:$0xff]  }
  0xe1   :  { %v1299_v5 = vld [vmem:[#allocation7 + $0x1b0] sm:$0xff]  }
  0xe2   :  { %1156 = vmatpush3.bf16.msra.mxu0 %v1270_v6  ;;  %1178 = vmatpush3.bf16.msra.mxu1 %v1271_v7  ;;  %v1300_v6 = vld [vmem:[#allocation7 + $0x178] sm:$0xff]  }
  0xe3   :  { %1185 = vmatprep.subr.bf16.mxu0 %v1272_v8  ;;  %1207 = vmatprep.subr.bf16.mxu1 %v1273_v9  ;;  %v1301_v7 = vld [vmem:[#allocation7 + $0x1f8] sm:$0xff]   ;;  %v339_v8 = vld [vmem:[#allocation2 + $0x20] sm:$0xff]  ;;  %v341_v9 = vld [vmem:[#allocation2 + $0x30] sm:$0xff] }
 0x190   :  { %v205_v14 = vpop.f32.mrb[0].mxu0  ;;  %v246_v15 = vpop.f32.mrb[0].mxu1 }
 0x191   :  { %v343_v16 = vmul.f32 %v335_v10, %v205_v14  ;;  %v345_v17 = vmul.f32 %v337_v11, %v246_v15  ;;  %v207_v18 = vpop.f32.mrb[1].mxu0  ;;  %v248_v19 = vpop.f32.mrb[1].mxu1  ;;  %v1302_v10 = vld [vmem:[#allocation7 + $0x138] sm:$0xff]  }
 0x192   :  { %v344_v20 = vmul.f32 %v336_v12, %v207_v18  ;;  %v346_v21 = vmul.f32 %v338_v13, %v248_v19  ;;  %v209_v22 = vpop.f32.mrb[2].mxu0  ;;  %v250_v23 = vpop.f32.mrb[2].mxu1  ;;  %v1303_v11 = vld [vmem:[#allocation7 + $0x1b8] sm:$0xff]   ;;  %v1076_v18 = vld [vmem:[%s1511_s4] ss:$0 sm:$0xff]  ;;  %s1407_s4 = smov [#allocation8]  }
 0x193   :  { %v210_v24 = vpop.f32.mrb[3].mxu0  ;;  %v251_v25 = vpop.f32.mrb[3].mxu1  ;;  %v351_v30 = vpack.c.bf16 %v343_v16, %v343_v16  ;;  %v353_v31 = vpack.c.bf16 %v345_v17, %v345_v17  ;;  %s1045_s8 = sshll.u32 %s1407_s4, 4  ;;  %s1046_s8 = int_to_ptr.vmem [resolvable:$true] %s1045_s8 }
 0x194   :  { %v352_v26 = vpack.c.bf16 %v344_v20, %v344_v20  ;;  %v354_v27 = vpack.c.bf16 %v346_v21, %v346_v21  ;;  %s1370_s9 = scalar_lea.vmem %s1046_s8, 128  ;;  %p1375_p11 = scmp.lt.s32.totalorder %s1046_s8, %s1046_s8 }
 0x195   :  { %p1371_p10 = scmp.ne.s32.totalorder %s1046_s8, %s1370_s9  ;;  %p1376_p12 = scmp.lt.s32.totalorder %s1370_s9, %s1370_s9 }
 0x196   :  { %910 = vmatprep.mubr.bf16.mxu0 %v352_v26  ;;  %950 = vmatprep.mubr.bf16.mxu1 %v354_v27 }
 0x197   :  { %911 = vmatmul.mubr.bf16.vlgmr.msra.gmra.mrb[8].mxu0 %v351_v30  ;;  %951 = vmatmul.mubr.bf16.vlgmr.msra.gmra.mrb[8].mxu1 %v353_v31  ;;  %p1377_p13 = por %p1376_p12, %p1375_p11 }
 0x198   :  { %1186 = vmatpush3.bf16.msra.mxu0 %v1274_v28  ;;  %1208 = vmatpush3.bf16.msra.mxu1 %v1275_v29  ;;  %v1486_v36 = vpop.f32.mrb[4].mxu0  ;;  %v1488_v37 = vpop.f32.mrb[4].mxu1 }
 0x199   :  { %v289_v40 = vpop.f32.mrb[5].mxu0  ;;  %v330_v41 = vpop.f32.mrb[5].mxu1  ;;  %1187 = vmatprep.subr.bf16.mxu0 %v1276_v32  ;;  %1209 = vmatprep.subr.bf16.mxu1 %v1277_v33  ;;  %v347_v12 = vmul.f32 %v339_v8, %v1486_v36  ;;  %v349_v13 = vmul.f32 %v341_v9, %v1488_v37  ;;  %p1378_p0 = pnand %p1377_p13, %p1371_p10 }
 0x19a   :  { %v348_v44 = vmul.f32 %v340_v34, %v289_v40  ;;  %v350_v45 = vmul.f32 %v342_v35, %v330_v41  ;;  %v291_v46 = vpop.f32.mrb[6].mxu0  ;;  %v332_v47 = vpop.f32.mrb[6].mxu1 }
 0x19b   :  { %v292_v48 = vpop.f32.mrb[7].mxu0  ;;  %v333_v49 = vpop.f32.mrb[7].mxu1  ;;  %v355_v14 = vpack.c.bf16 %v347_v12, %v347_v12  ;;  %v357_v15 = vpack.c.bf16 %v349_v13, %v349_v13 }
 0x19c   :  { %v356_v50 = vpack.c.bf16 %v348_v44, %v348_v44  ;;  %v358_v51 = vpack.c.bf16 %v350_v45, %v350_v45  ;;  %1188 = vmatpush3.bf16.msra.mxu0 %v1278_v38  ;;  %1210 = vmatpush3.bf16.msra.mxu1 %v1279_v39 }
 0x19d   :  { %1189 = vmatprep.subr.bf16.mxu0 %v1280_v42  ;;  %1211 = vmatprep.subr.bf16.mxu1 %v1281_v43 }
 0x19e   :  { %990 = vmatprep.mubr.bf16.mxu0 %v356_v50  ;;  %1030 = vmatprep.mubr.bf16.mxu1 %v358_v51 }
 0x1a0   :  { %1190 = vmatpush3.bf16.msra.mxu0 %v1282_v52  ;;  %1212 = vmatpush3.bf16.msra.mxu1 %v1283_v53 }
 0x1a1   :  { %1191 = vmatprep.subr.bf16.mxu0 %v1284_v54  ;;  %1213 = vmatprep.subr.bf16.mxu1 %v1285_v55 }
 0x1a4   :  { %1192 = vmatpush3.bf16.msra.mxu0 %v1286_v56  ;;  %1214 = vmatpush3.bf16.msra.mxu1 %v1287_v57 }
 0x1a5   :  { %1193 = vmatprep.subr.bf16.mxu0 %v1288_v58  ;;  %1215 = vmatprep.subr.bf16.mxu1 %v1289_v59 }
 0x1a8   :  { %1194 = vmatpush3.bf16.msra.mxu0 %v1290_v60  ;;  %1216 = vmatpush3.bf16.msra.mxu1 %v1291_v61 }
 0x1a9   :  { %1195 = vmatprep.subr.bf16.mxu0 %v1292_v62  ;;  %1217 = vmatprep.subr.bf16.mxu1 %v1293_v63 }
 0x1ac   :  { %1196 = vmatpush3.bf16.msra.mxu0 %v1294_v0  ;;  %1218 = vmatpush3.bf16.msra.mxu1 %v1295_v1 }
 0x1ad   :  { %1197 = vmatprep.subr.bf16.mxu0 %v1296_v2  ;;  %1219 = vmatprep.subr.bf16.mxu1 %v1297_v3 }
 0x1b0   :  { %1198 = vmatpush3.bf16.msra.mxu0 %v1298_v4  ;;  %1220 = vmatpush3.bf16.msra.mxu1 %v1299_v5 }
 0x1b1   :  { %1199 = vmatprep.subr.bf16.mxu0 %v1300_v6  ;;  %1221 = vmatprep.subr.bf16.mxu1 %v1301_v7 }
 0x1b4   :  { %1200 = vmatpush3.bf16.msra.mxu0 %v1302_v10  ;;  %1222 = vmatpush3.bf16.msra.mxu1 %v1303_v11 }
 0x1b7   :  { %991 = vmatmul.mubr.bf16.vlgmr.msra.gmra.mrb[12].mxu0 %v355_v14  ;;  %1031 = vmatmul.mubr.bf16.vlgmr.msra.gmra.mrb[12].mxu1 %v357_v15 }
 0x26a   :  { %v1157_v16 = vpop.f32.mrb[8].mxu0  ;;  %v1179_v17 = vpop.f32.mrb[8].mxu1 }
 0x26b   :  { %v1158_v19 = vpop.f32.mrb[9].mxu0  ;;  %v1180_v20 = vpop.f32.mrb[9].mxu1 }
 0x26c   :  { %v1159_v21 = vadd.f32 %v1158_v19, %v1157_v16  ;;  %v1181_v22 = vadd.f32 %v1180_v20, %v1179_v17  ;;  %v1160_v23 = vpop.f32.mrb[10].mxu0  ;;  %v1182_v24 = vpop.f32.mrb[10].mxu1 }
 0x26d   :  { %v1161_v25 = vpop.f32.mrb[11].mxu0  ;;  %v1183_v26 = vpop.f32.mrb[11].mxu1 }
 0x26e   :  { %v913_v27 = vadd.f32 %v1159_v21, %v1076_v18 }
 0x270   :  { %v953_v28 = vadd.f32 %v1181_v22, %v913_v27 }
 0x28a   :  { %v1201_v29 = vpop.f32.mrb[12].mxu0  ;;  %v1223_v30 = vpop.f32.mrb[12].mxu1 }
 0x28b   :  { %v1202_v31 = vpop.f32.mrb[13].mxu0  ;;  %v1224_v32 = vpop.f32.mrb[13].mxu1 }
 0x28c   :  { %v1203_v33 = vadd.f32 %v1202_v31, %v1201_v29  ;;  %v1225_v34 = vadd.f32 %v1224_v32, %v1223_v30  ;;  %v1204_v35 = vpop.f32.mrb[14].mxu0  ;;  %v1226_v36 = vpop.f32.mrb[14].mxu1 }
 0x28d   :  { %v1205_v37 = vpop.f32.mrb[15].mxu0  ;;  %v1227_v38 = vpop.f32.mrb[15].mxu1 }
 0x28e   :  { %v993_v39 = vadd.f32 %v1203_v33, %v953_v28 }
 0x290   :  { %v1033_v40 = vadd.f32 %v1225_v34, %v993_v39 }
 0x292   :  { %1038 = vst [vmem:[#allocation8] sm:$0xff] %v1033_v40 }
 0x293   :  { %1381 = shalt.err (!%p1378_p0)
}
 0x294   :  { %s1382_s12 = scalar_lea.hbm %s1512_s5, 128 }
 0x295   :  { %p1383_p1 = scmp.ne.s32.totalorder %s1512_s5, %s1382_s12  ;;  %p1386_p2 = scmp.lt.u32.totalorder %s1382_s12, %s1512_s5 }
 0x297   :  { %p1388_p3 = pnand %p1386_p2, %p1383_p1 }
 0x299   :  { %1391 = shalt.err (!%p1388_p3)
}
 0x29a   :  { %1048 = dma.vmem_to_hbm [thread:$0]  %s1046_s8, 128, %s1512_s5, [#allocation4]  }
 0x29b   :  { %1396 = dma.done.wait [#allocation4], 128  }
 0x29c   :  { %1397 = vsyncadd [#allocation4], 4294967168 }
 0x29d   :  { %1052 = vsyncpa [#allocation3], 1 }
 0x29e   :  { %1053 = vsyncpa [#allocation6], 1 }
 0x29f   :  { %1054 = vsyncpa [#allocation4], 1 }

</bundles_post_ra>
